<compile_context>
chip_gen: v7x
topology: tpu7x:2x2x1
jax: 0.10.0
libtpu: 0.0.40
codegen_flags: <defaults>
</compile_context>

<pallas_src>
import functools

import jax
import jax.numpy as jnp
from jax import lax
from jax.experimental import pallas as pl
from jax.experimental.pallas import tpu as pltpu


def _round_up(x, m):
    return ((x + m - 1) // m) * m


def _tpu_generation_defaults():
    """Returns (is_v7x, usable_vmem_bytes, mxu_pad_multiple), with safe fallbacks."""
    kind = ""
    try:
        kind = jax.devices()[0].device_kind.lower()
    except Exception:
        pass
    is_v7 = "7" in kind
    vmem_cap = None
    try:
        vmem_cap = getattr(pltpu.get_tpu_info(), "vmem_capacity_bytes", None)
    except Exception:
        vmem_cap = None
    if not vmem_cap:
        vmem_cap = (64 << 20) if is_v7 else (128 << 20)
    # Never request the full physical VMEM: leave headroom for Mosaic internal scratch.
    usable = int(vmem_cap * 0.82)            # ~52 MiB on v7x, ~105 MiB on v5e/v6e
    mxu_pad = 128 if "v5" in kind else 256   # v5e MXU is 128-wide; v6e/v7x are 256-wide
    return is_v7, usable, mxu_pad


# ----------------------------------------------------------------------------
# Kernels
# ----------------------------------------------------------------------------
def _mlp_kernel_resident(L, x_ref, w_in_ref, b_in_ref, *refs):
    """All weights resident in VMEM (Buffered(1) constant blocks)."""
    if L > 0:
        w_h_ref, b_h_ref, w_out_ref, b_out_ref, o_ref = refs
    else:
        w_out_ref, b_out_ref, o_ref = refs

    # input_linear + input_relu: bf16 MXU inputs, f32 accumulate / epilogue.
    acc = jnp.dot(x_ref[...], w_in_ref[...],
                  preferred_element_type=jnp.float32) + b_in_ref[...]
    h = jnp.maximum(acc, 0.0).astype(jnp.bfloat16)   # bf16 carry: halves vld/vst traffic

    if 0 < L <= 16:
        # small L: fully unrolled (L is a compile-time int) for LLO scheduling visibility
        for l in range(L):
            acc = jnp.dot(h, w_h_ref[l],
                          preferred_element_type=jnp.float32) + b_h_ref[l]
            h = jnp.maximum(acc, 0.0).astype(jnp.bfloat16)
    elif L > 16:
        # large L: bounded trace size; unroll=2 overlaps epilogue with next layer's MXU
        def body(l, h_carry):
            a = jnp.dot(h_carry, w_h_ref[l],
                        preferred_element_type=jnp.float32) + b_h_ref[l]
            return jnp.maximum(a, 0.0).astype(jnp.bfloat16)
        h = lax.fori_loop(0, L, body, h, unroll=2)

    # output_linear (out_features=1), lane-dense: (1,H) . (bt,H)^T -> (1, bt)
    o = lax.dot_general(w_out_ref[...], h,
                        dimension_numbers=(((1,), (1,)), ((), ())),
                        preferred_element_type=jnp.float32)
    o_ref[...] = (o + b_out_ref[0]).astype(o_ref.dtype)


def _mlp_kernel_stream(L, x_ref, w_in_ref, b_in_ref, w_h_hbm, b_h_ref,
                       w_out_ref, b_out_ref, o_ref, h_ref, wbuf, sem):
    """Hidden weights stay in HBM; per-layer (H,H) tiles are double-buffered by DMA."""
    # Prime layer-0 weight DMA; it hides behind the input matmul.
    pltpu.make_async_copy(w_h_hbm.at[0], wbuf.at[0], sem.at[0]).start()

    acc = jnp.dot(x_ref[...], w_in_ref[...],
                  preferred_element_type=jnp.float32) + b_in_ref[...]
    h_ref[...] = jnp.maximum(acc, 0.0).astype(jnp.bfloat16)

    @pl.loop(0, L)
    def _(l):
        slot = l & 1
        pltpu.make_async_copy(w_h_hbm.at[0], wbuf.at[slot], sem.at[slot]).wait()

        @pl.when(l + 1 < L)
        def _():
            pltpu.make_async_copy(w_h_hbm.at[l + 1], wbuf.at[1 - slot],
                                  sem.at[1 - slot]).start()

        a = jnp.dot(h_ref[...], wbuf[slot],
                    preferred_element_type=jnp.float32) + b_h_ref[l]
        h_ref[...] = jnp.maximum(a, 0.0).astype(jnp.bfloat16)

    o = lax.dot_general(w_out_ref[...], h_ref[...],
                        dimension_numbers=(((1,), (1,)), ((), ())),
                        preferred_element_type=jnp.float32)
    o_ref[...] = (o + b_out_ref[0]).astype(o_ref.dtype)


# ----------------------------------------------------------------------------
# Wrapper
# ----------------------------------------------------------------------------
def struct2param_forward(features, params, *, num_hidden_layer,
                         batch_tile=None, stream_hidden_weights=None):
    """features: (B, F) float32.  Returns squeeze((B, 1)) == (B,) f32 (scalar if B==1)."""
    w_in, b_in, w_h, b_h, w_out_row, b_out = params
    B, F = features.shape
    H = w_in.shape[1]
    L = int(num_hidden_layer)
    Lh = w_h.shape[0]                      # == max(L, 1)
    assert Lh == max(L, 1)

    _, vmem_usable, mxu_pad = _tpu_generation_defaults()

    # --- pad F / H to MXU tile; padded units are exactly 0 through every layer ----
    Fp = _round_up(max(F, 1), 128)
    Hp = _round_up(max(H, 1), mxu_pad)

    def pad2(a, rows, cols):
        return jnp.pad(a, ((0, rows - a.shape[0]), (0, cols - a.shape[1])))

    x = pad2(features.astype(jnp.bfloat16), B, Fp)
    w_in_b = pad2(w_in.astype(jnp.bfloat16), Fp, Hp)
    b_in_f = pad2(b_in.astype(jnp.float32), 1, Hp)
    w_h_b = jnp.pad(w_h.astype(jnp.bfloat16), ((0, 0), (0, Hp - H), (0, Hp - H)))
    b_h_f = jnp.pad(b_h.astype(jnp.float32), ((0, 0), (0, 0), (0, Hp - H)))
    w_out_b = pad2(w_out_row.astype(jnp.bfloat16), 1, Hp)
    b_out_f = b_out.reshape((1,)).astype(jnp.float32)   # SMEM scalar

    # --- batch tiling: >=2 grid steps when B >= 256 (v7x dual-TC sharding) --------
    if batch_tile is None:
        if B >= 256:
            batch_tile = max(128, min(512, _round_up((B + 1) // 2, 128)))
        else:
            batch_tile = B
    if batch_tile < B:
        assert batch_tile % 128 == 0, "batch_tile must be a multiple of 128 when tiling"
    Bp = _round_up(B, batch_tile)
    if Bp != B:
        x = jnp.pad(x, ((0, Bp - B), (0, 0)))            # extra rows computed then dropped
    bt = batch_tile
    grid = (Bp // bt,)

    # --- resident vs streamed hidden weights --------------------------------------
    resident_w_bytes = 2 * (Fp * Hp + Lh * Hp * Hp + Hp)         # bf16, Buffered(1)
    if stream_hidden_weights is None:
        stream_hidden_weights = (L > 0) and (2 * Lh * Hp * Hp > vmem_usable // 2)
    stream = bool(stream_hidden_weights) and (L > 0)

    # --- VMEM budget ----------------------------------------------------------------
    bias_bytes = 4 * (Hp + Lh * Hp + 8)
    io_bytes = 2 * (2 * bt * Fp) + 2 * (4 * 8 * bt)              # x tiles (x2) + out tiles
    act_bytes = 6 * bt * Hp * 4                                  # f32 acc + bf16 carry + slack
    if stream:
        w_bytes = 2 * (Fp * Hp + Hp) + 2 * (2 * Hp * Hp) + 2 * bt * Hp
    else:
        w_bytes = resident_w_bytes
    est = w_bytes + bias_bytes + io_bytes + act_bytes
    vmem_limit = int(min(vmem_usable, max(int(1.5 * est), 32 << 20)))

    # --- advisory cost estimate for the XLA scheduler -------------------------------
    flops = 2 * Bp * (Fp * Hp + L * Hp * Hp + Hp)
    w_h_reads = grid[0] if stream else 1                          # streamed weights re-read per tile
    bytes_accessed = (x.size * 2 + w_in_b.size * 2 + w_h_b.size * 2 * w_h_reads
                      + w_out_b.size * 2 + b_in_f.size * 4 + b_h_f.size * 4 + 4 + Bp * 4)
    cost = pl.CostEstimate(flops=int(flops), transcendentals=0,
                           bytes_accessed=int(bytes_accessed))

    # --- specs -----------------------------------------------------------------------
    x_spec = pl.BlockSpec((bt, Fp), lambda i: (i, 0))
    w_in_spec = pl.BlockSpec((Fp, Hp), lambda i: (0, 0), pipeline_mode=pl.Buffered(1))
    b_in_spec = pl.BlockSpec((1, Hp), lambda i: (0, 0), pipeline_mode=pl.Buffered(1))
    b_h_spec = pl.BlockSpec((Lh, 1, Hp), lambda i: (0, 0, 0), pipeline_mode=pl.Buffered(1))
    w_out_spec = pl.BlockSpec((1, Hp), lambda i: (0, 0), pipeline_mode=pl.Buffered(1))
    b_out_spec = pl.BlockSpec(memory_space=pltpu.MemorySpace.SMEM)
    out_spec = pl.BlockSpec((1, bt), lambda i: (0, i))            # lane-dense output slab

    if stream:
        kernel = functools.partial(_mlp_kernel_stream, L)
        in_specs = [x_spec, w_in_spec, b_in_spec,
                    pl.BlockSpec(memory_space=pl.ANY),            # w_h stays in HBM
                    b_h_spec, w_out_spec, b_out_spec]
        args = (x, w_in_b, b_in_f, w_h_b, b_h_f, w_out_b, b_out_f)
        scratch = [pltpu.VMEM((bt, Hp), jnp.bfloat16),            # bf16 activation carry
                   pltpu.VMEM((2, Hp, Hp), jnp.bfloat16),         # double-buffered layer weights
                   pltpu.SemaphoreType.DMA((2,))]
    else:
        kernel = functools.partial(_mlp_kernel_resident, L)
        if L > 0:
            w_h_spec = pl.BlockSpec((Lh, Hp, Hp), lambda i: (0, 0, 0),
                                    pipeline_mode=pl.Buffered(1))
            in_specs = [x_spec, w_in_spec, b_in_spec, w_h_spec, b_h_spec,
                        w_out_spec, b_out_spec]
            args = (x, w_in_b, b_in_f, w_h_b, b_h_f, w_out_b, b_out_f)
        else:
            # L == 0: no hidden weights are DMA'd at all
            in_specs = [x_spec, w_in_spec, b_in_spec, w_out_spec, b_out_spec]
            args = (x, w_in_b, b_in_f, w_out_b, b_out_f)
        scratch = []

    out = pl.pallas_call(
        kernel,
        out_shape=jax.ShapeDtypeStruct((1, Bp), jnp.float32),
        grid_spec=pltpu.PrefetchScalarGridSpec(
            num_scalar_prefetch=0,
            grid=grid,
            in_specs=in_specs,
            out_specs=out_spec,
            scratch_shapes=scratch),
        compiler_params=pltpu.CompilerParams(
            dimension_semantics=("parallel",),
            vmem_limit_bytes=vmem_limit),
        cost_estimate=cost,
    )(*args)

    out = out[0, :B]                       # (B,)
    return jnp.squeeze(out)                # matches torch .squeeze() (scalar if B == 1)


# ----------------------------------------------------------------------------
# Params / reference
# ----------------------------------------------------------------------------
def init_params(key, num_features, hidden_layer_width, num_hidden_layer,
                dtype=jnp.float32):
    """Deterministic init mirroring torch.nn.Linear's U(-1/sqrt(fan_in), +)."""
    F, H, L = num_features, hidden_layer_width, num_hidden_layer
    Lh = max(L, 1)
    ks = jax.random.split(key, 6)

    def u(k, shape, fan_in):
        bound = 1.0 / jnp.sqrt(jnp.asarray(fan_in, dtype))
        return jax.random.uniform(k, shape, dtype, -bound, bound)

    w_in = u(ks[0], (F, H), F)            # stored as (in, out) = W^T
    b_in = u(ks[1], (1, H), F)
    w_h = u(ks[2], (Lh, H, H), H)
    b_h = u(ks[3], (Lh, 1, H), H)
    w_out = u(ks[4], (1, H), H)           # output weight as a lane-dense row (torch (1, H))
    b_out = u(ks[5], (1,), H)
    return (w_in, b_in, w_h, b_h, w_out, b_out)


def reference_forward(features, params, num_hidden_layer):
    """Pure-JAX reference mirroring the kernel's bf16-matmul / f32-accumulate math."""
    w_in, b_in, w_h, b_h, w_out_row, b_out = params
    h = jnp.dot(features.astype(jnp.bfloat16), w_in.astype(jnp.bfloat16),
                preferred_element_type=jnp.float32) + b_in
    h = jnp.maximum(h, 0.0)
    for l in range(num_hidden_layer):
        h = jnp.dot(h.astype(jnp.bfloat16), w_h[l].astype(jnp.bfloat16),
                    preferred_element_type=jnp.float32) + b_h[l]
        h = jnp.maximum(h, 0.0)
    o = jnp.dot(h.astype(jnp.bfloat16), w_out_row.astype(jnp.bfloat16).T,
                preferred_element_type=jnp.float32) + b_out
    return jnp.squeeze(o)


if __name__ == "__main__":
    key = jax.random.PRNGKey(0)

    # Config A: default (resident weights) path.
    batch, F, H, L = 8, 16, 32, 1
    kp, kx, key = jax.random.split(key, 3)
    params = init_params(kp, F, H, L)
    x = jax.random.normal(kx, (batch, F), jnp.float32)
    out = jax.block_until_ready(struct2param_forward(x, params, num_hidden_layer=L))
    ref = reference_forward(x, params, L)
    assert out.shape == (batch,)
    assert jnp.allclose(out, ref, atol=1e-2, rtol=1e-2), (out, ref)

    # Config B: forced hidden-weight streaming path (manual DMA double-buffer).
    batch, F, H, L = 8, 16, 32, 3
    kp, kx, key = jax.random.split(key, 3)
    params = init_params(kp, F, H, L)
    x = jax.random.normal(kx, (batch, F), jnp.float32)
    out = jax.block_until_ready(
        struct2param_forward(x, params, num_hidden_layer=L, stream_hidden_weights=True))
    ref = reference_forward(x, params, L)
    assert out.shape == (batch,)
    assert jnp.allclose(out, ref, atol=1e-2, rtol=1e-2), (out, ref)

    # Config C: num_hidden_layer == 0 (no hidden-weight DMA at all).
    batch, F, H, L = 4, 16, 32, 0
    kp, kx, key = jax.random.split(key, 3)
    params = init_params(kp, F, H, L)
    x = jax.random.normal(kx, (batch, F), jnp.float32)
    out = jax.block_until_ready(struct2param_forward(x, params, num_hidden_layer=L))
    ref = reference_forward(x, params, L)
    assert out.shape == (batch,)
    assert jnp.allclose(out, ref, atol=1e-2, rtol=1e-2), (out, ref)

    print("KERNEL_OK")
</pallas_src>

<mosaic_0001>
module attributes {stable_mosaic.version = 11 : i64} {
  func.func @_mlp_kernel_resident(%arg0: i32, %arg1: memref<8x128xbf16, #tpu.memory_space<vmem>>, %arg2: memref<128x256xbf16, #tpu.memory_space<vmem>>, %arg3: memref<1x256xf32, #tpu.memory_space<vmem>>, %arg4: memref<1x256x256xbf16, #tpu.memory_space<vmem>>, %arg5: memref<1x1x256xf32, #tpu.memory_space<vmem>>, %arg6: memref<1x256xbf16, #tpu.memory_space<vmem>>, %arg7: memref<1xf32, #tpu.memory_space<smem>>, %arg8: memref<1x8xf32, #tpu.memory_space<vmem>>) attributes {dimension_semantics = [#tpu.dimension_semantics<parallel>], iteration_bounds = array<i64: 1>, scalar_prefetch = 0 : i64, scratch_operands = 0 : i64, tpu.core_type = #tpu.core_type<tc>, window_params = [{transform_indices = @transform_0, window_bounds = array<i64: 8, 128>}, {pipeline_mode = #tpu.pipeline_mode<synchronous>, transform_indices = @transform_1, window_bounds = array<i64: 128, 256>}, {pipeline_mode = #tpu.pipeline_mode<synchronous>, transform_indices = @transform_2, window_bounds = array<i64: 1, 256>}, {pipeline_mode = #tpu.pipeline_mode<synchronous>, transform_indices = @transform_3, window_bounds = array<i64: 1, 256, 256>}, {pipeline_mode = #tpu.pipeline_mode<synchronous>, transform_indices = @transform_4, window_bounds = array<i64: 1, 1, 256>}, {pipeline_mode = #tpu.pipeline_mode<synchronous>, transform_indices = @transform_5, window_bounds = array<i64: 1, 256>}, {transform_indices = @transform_6, window_bounds = array<i64: 1>}, {transform_indices = @transform_7, window_bounds = array<i64: 1, 8>}]} {
    %c0 = arith.constant 0 : index
    %c0_0 = arith.constant 0 : index
    %0 = vector.load %arg1[%c0, %c0_0] : memref<8x128xbf16, #tpu.memory_space<vmem>>, vector<8x128xbf16>
    %c0_1 = arith.constant 0 : index
    %c0_2 = arith.constant 0 : index
    %1 = vector.load %arg2[%c0_1, %c0_2] : memref<128x256xbf16, #tpu.memory_space<vmem>>, vector<128x256xbf16>
    %cst = arith.constant dense<0.000000e+00> : vector<8x256xf32>
    %2 = tpu.matmul %0, %1, %cst {dimension_numbers = #tpu.dot_dimension_numbers<[1], [0], [0], [1], [0, 0, 1, 1], [], []>} : vector<8x128xbf16>, vector<128x256xbf16>, vector<8x256xf32> -> vector<8x256xf32>
    %c0_3 = arith.constant 0 : index
    %c0_4 = arith.constant 0 : index
    %3 = vector.load %arg3[%c0_3, %c0_4] : memref<1x256xf32, #tpu.memory_space<vmem>>, vector<1x256xf32>
    %4 = vector.broadcast %3 : vector<1x256xf32> to vector<8x256xf32>
    %5 = arith.addf %2, %4 : vector<8x256xf32>
    %cst_5 = arith.constant 0.000000e+00 : f32
    %6 = vector.broadcast %cst_5 : f32 to vector<8x256xf32>
    %7 = arith.maximumf %5, %6 : vector<8x256xf32>
    %8 = arith.truncf %7 : vector<8x256xf32> to vector<8x256xbf16>
    %c0_6 = arith.constant 0 : index
    %c0_7 = arith.constant 0 : index
    %c0_8 = arith.constant 0 : index
    %9 = vector.load %arg4[%c0_6, %c0_7, %c0_8] : memref<1x256x256xbf16, #tpu.memory_space<vmem>>, vector<1x256x256xbf16>
    %10 = vector.shape_cast %9 : vector<1x256x256xbf16> to vector<256x256xbf16>
    %cst_9 = arith.constant dense<0.000000e+00> : vector<8x256xf32>
    %11 = tpu.matmul %8, %10, %cst_9 {dimension_numbers = #tpu.dot_dimension_numbers<[1], [0], [0], [1], [0, 0, 1, 1], [], []>} : vector<8x256xbf16>, vector<256x256xbf16>, vector<8x256xf32> -> vector<8x256xf32>
    %c0_10 = arith.constant 0 : index
    %c0_11 = arith.constant 0 : index
    %c0_12 = arith.constant 0 : index
    %12 = vector.load %arg5[%c0_10, %c0_11, %c0_12] : memref<1x1x256xf32, #tpu.memory_space<vmem>>, vector<1x1x256xf32>
    %13 = vector.shape_cast %12 : vector<1x1x256xf32> to vector<1x256xf32>
    %14 = vector.broadcast %13 : vector<1x256xf32> to vector<8x256xf32>
    %15 = arith.addf %11, %14 : vector<8x256xf32>
    %cst_13 = arith.constant 0.000000e+00 : f32
    %16 = vector.broadcast %cst_13 : f32 to vector<8x256xf32>
    %17 = arith.maximumf %15, %16 : vector<8x256xf32>
    %18 = arith.truncf %17 : vector<8x256xf32> to vector<8x256xbf16>
    %c0_14 = arith.constant 0 : index
    %c0_15 = arith.constant 0 : index
    %19 = vector.load %arg6[%c0_14, %c0_15] : memref<1x256xbf16, #tpu.memory_space<vmem>>, vector<1x256xbf16>
    %cst_16 = arith.constant dense<0.000000e+00> : vector<1x8xf32>
    %20 = tpu.matmul %19, %18, %cst_16 {dimension_numbers = #tpu.dot_dimension_numbers<[1], [1], [0], [0], [0, 0, 1, 0], [], []>} : vector<1x256xbf16>, vector<8x256xbf16>, vector<1x8xf32> -> vector<1x8xf32>
    %c0_17 = arith.constant 0 : index
    %21 = memref.load %arg7[%c0_17] : memref<1xf32, #tpu.memory_space<smem>>
    %22 = vector.broadcast %21 : f32 to vector<1x8xf32>
    %23 = arith.addf %20, %22 : vector<1x8xf32>
    %c0_18 = arith.constant 0 : index
    %c0_19 = arith.constant 0 : index
    %24 = vector.load %arg8[%c0_18, %c0_19] : memref<1x8xf32, #tpu.memory_space<vmem>>, vector<1x8xf32>
    tpu.vector_store %arg8[%c0_18, %c0_19], %23 {strides = array<i32>} : memref<1x8xf32, #tpu.memory_space<vmem>>, vector<1x8xf32>,
    return
  }
  func.func @transform_0(%arg0: i32) -> (i32, i32) {
    %c0_i32 = arith.constant 0 : i32
    %c0_i32_0 = arith.constant 0 : i32
    return %arg0, %c0_i32 : i32, i32
  }
  func.func @transform_1(%arg0: i32) -> (i32, i32) {
    %c0_i32 = arith.constant 0 : i32
    %c0_i32_0 = arith.constant 0 : i32
    %c0_i32_1 = arith.constant 0 : i32
    return %c0_i32, %c0_i32_0 : i32, i32
  }
  func.func @transform_2(%arg0: i32) -> (i32, i32) {
    %c0_i32 = arith.constant 0 : i32
    %c0_i32_0 = arith.constant 0 : i32
    %c0_i32_1 = arith.constant 0 : i32
    return %c0_i32, %c0_i32_0 : i32, i32
  }
  func.func @transform_3(%arg0: i32) -> (i32, i32, i32) {
    %c0_i32 = arith.constant 0 : i32
    %c0_i32_0 = arith.constant 0 : i32
    %c0_i32_1 = arith.constant 0 : i32
    %c0_i32_2 = arith.constant 0 : i32
    return %c0_i32, %c0_i32_0, %c0_i32_1 : i32, i32, i32
  }
  func.func @transform_4(%arg0: i32) -> (i32, i32, i32) {
    %c0_i32 = arith.constant 0 : i32
    %c0_i32_0 = arith.constant 0 : i32
    %c0_i32_1 = arith.constant 0 : i32
    %c0_i32_2 = arith.constant 0 : i32
    return %c0_i32, %c0_i32_0, %c0_i32_1 : i32, i32, i32
  }
  func.func @transform_5(%arg0: i32) -> (i32, i32) {
    %c0_i32 = arith.constant 0 : i32
    %c0_i32_0 = arith.constant 0 : i32
    %c0_i32_1 = arith.constant 0 : i32
    return %c0_i32, %c0_i32_0 : i32, i32
  }
  func.func @transform_6(%arg0: i32) -> i32 {
    %c0_i32 = arith.constant 0 : i32
    %c0_i32_0 = arith.constant 0 : i32
    return %c0_i32 : i32
  }
  func.func @transform_7(%arg0: i32) -> (i32, i32) {
    %c0_i32 = arith.constant 0 : i32
    %c0_i32_0 = arith.constant 0 : i32
    return %c0_i32, %arg0 : i32, i32
  }
}

</mosaic_0001>

<bundles_post_ra>
// kernel: tpu_custom_call.1
= control target key start
LH: loop header
LB: loop body
LE: loop exit
PB: predicated region body
PF: predicated region fallthrough
CT: control target
= control target key end

     0   :  { %13 = vsyncpa [#allocation4], 0  ;;  %s894_s0 = inlined_call_operand.hbm [shape: bf16[8,128], index: 0, kind: input, shape index: {}]   ;;  %s895_s1 = inlined_call_operand.hbm [shape: bf16[128,256], index: 1, kind: input, shape index: {}]   ;;  %s896_s2 = inlined_call_operand.vmem [shape: f32[1,256], index: 2, kind: input, shape index: {}]   ;;  %s897_s3 = inlined_call_operand.hbm [shape: bf16[1,256,256], index: 3, kind: input, shape index: {}]   ;;  %s898_s4 = inlined_call_operand.vmem [shape: f32[1,1,256], index: 4, kind: input, shape index: {}]   ;;  %s899_s5 = inlined_call_operand.vmem [shape: bf16[1,256], index: 5, kind: input, shape index: {}]   ;;  %s900_s6 = inlined_call_operand.<no memory space> [shape: f32[1], index: 6, kind: input, shape index: {}]   ;;  %s901_s7 = inlined_call_operand.hbm [shape: f32[1,8], index: 7, kind: output, shape index: {}]  }
   0x1   :  { %14 = vsyncpa [#allocation7], 0 }
   0x2   :  { %15 = vsyncpa [#allocation5], 0  ;;  %s780_s24 = smov [#allocation6]   ;;  %s686_s28 = scalar_lea.hbm %s895_s1, 2048 }
   0x3   :  { %s31_s25 = sshll.u32 %s780_s24, 4  ;;  %p687_p0 = scmp.ne.s32.totalorder %s895_s1, %s686_s28  ;;  %s32_s25 = int_to_ptr.vmem [resolvable:$true] %s31_s25 }
   0x4   :  { %p690_p1 = scmp.lt.u32.totalorder %s686_s28, %s895_s1 }
   0x6   :  { %p692_p2 = pnand %p690_p1, %p687_p0 }
   0x8   :  { %695 = shalt.err (!%p692_p2)
}
   0x9   :  { %s696_s10 = scalar_lea.vmem %s32_s25, 2048  ;;  %p701_p4 = scmp.lt.s32.totalorder %s32_s25, %s32_s25 }
   0xa   :  { %p697_p3 = scmp.ne.s32.totalorder %s32_s25, %s696_s10  ;;  %p702_p5 = scmp.lt.s32.totalorder %s696_s10, %s696_s10 }
   0xc   :  { %p703_p6 = por %p702_p5, %p701_p4 }
   0xe   :  { %p704_p7 = pnand %p703_p6, %p697_p3 }
  0x10   :  { %707 = shalt.err (!%p704_p7)
}
  0x11   :  { %s781_s11 = smov 128   ;;  %s782_s12 = smov 8  }
  0x12   :  { %37 = dma.hbm_to_vmem [thread:$0]  %s895_s1, 2048, %s32_s25, [#allocation7], %s781_s11, %s781_s11, %s782_s12  }
  0x13   :  { %s783_s15 = smov [#allocation3]   ;;  %s784_s17 = smov [#allocation8]  }
  0x14   :  { %s22_s16 = sshll.u32 %s783_s15, 4  ;;  %s45_s18 = sshll.u32 %s784_s17, 4  ;;  %s23_s16 = int_to_ptr.vmem [resolvable:$true] %s22_s16  ;;  %s46_s18 = int_to_ptr.vmem [resolvable:$true] %s45_s18 }
  0x15   :  { %s708_s21 = scalar_lea.hbm %s894_s0, 64 }
  0x16   :  { %p709_p8 = scmp.ne.s32.totalorder %s894_s0, %s708_s21  ;;  %p712_p9 = scmp.lt.u32.totalorder %s708_s21, %s894_s0 }
  0x18   :  { %p714_p10 = pnand %p712_p9, %p709_p8 }
  0x1a   :  { %717 = shalt.err (!%p714_p10)
}
  0x1b   :  { %s718_s1 = scalar_lea.vmem %s23_s16, 64  ;;  %p723_p12 = scmp.lt.s32.totalorder %s23_s16, %s23_s16 }
  0x1c   :  { %p719_p11 = scmp.ne.s32.totalorder %s23_s16, %s718_s1  ;;  %p724_p13 = scmp.lt.s32.totalorder %s718_s1, %s718_s1 }
  0x1e   :  { %p725_p0 = por %p724_p13, %p723_p12 }
  0x20   :  { %p726_p1 = pnand %p725_p0, %p719_p11 }
  0x22   :  { %729 = shalt.err (!%p726_p1)
}
  0x23   :  { %25 = dma.hbm_to_vmem [thread:$0]  %s894_s0, 64, %s23_s16, [#allocation4]  }
  0x24   :  { %s730_s30 = scalar_lea.hbm %s897_s3, 4096 }
  0x25   :  { %p731_p2 = scmp.ne.s32.totalorder %s897_s3, %s730_s30  ;;  %p734_p3 = scmp.lt.u32.totalorder %s730_s30, %s897_s3 }
  0x27   :  { %p736_p4 = pnand %p734_p3, %p731_p2 }
  0x29   :  { %739 = shalt.err (!%p736_p4)
}
  0x2a   :  { %s740_s14 = scalar_lea.vmem %s46_s18, 4096  ;;  %p745_p6 = scmp.lt.s32.totalorder %s46_s18, %s46_s18 }
  0x2b   :  { %p741_p5 = scmp.ne.s32.totalorder %s46_s18, %s740_s14  ;;  %p746_p7 = scmp.lt.s32.totalorder %s740_s14, %s740_s14 }
  0x2d   :  { %p747_p8 = por %p746_p7, %p745_p6 }
  0x2f   :  { %p748_p9 = pnand %p747_p8, %p741_p5 }
  0x31   :  { %751 = shalt.err (!%p748_p9)
}
  0x32   :  { %51 = dma.hbm_to_vmem [thread:$0]  %s897_s3, 4096, %s46_s18, [#allocation7], %s781_s11, %s781_s11, %s782_s12  }
  0x33   :  { %774 = dma.done.wait [#allocation4], 64  }
  0x34   :  { %775 = vsyncadd [#allocation4], 4294967232 }
  0x35   :  { %776 = dma.done.wait [#allocation7], 6144  }
  0x36   :  { %777 = vsyncadd [#allocation7], 4294961152  ;;  %v785_v0 = vmov 0   ;;  %v614_v1 = vld [vmem:[#allocation6 + $0x4] ss:$8 sps:$4 sm:$0xff]   ;;  %v87_v50 = vlaneseq  ;;  %vm539_vm0 = vcmask 57344  }
  0x37   :  { %209 = vmatprep.mubr.bf16.mxu0 %v785_v0  ;;  %v616_v2 = vld [vmem:[#allocation6] ss:$8 sps:$4 sm:$0xff]   ;;  %177 = vmatprep.subr.bf16.mxu0 %v614_v1  ;;  %v617_v3 = vld [vmem:[#allocation6 + $0x14] ss:$8 sps:$4 sm:$0xff]   ;;  %v619_v4 = vld [vmem:[#allocation6 + $0x10] ss:$8 sps:$4 sm:$0xff]  }
  0x38   :  { %178 = vmatpush1.bf16.msra.mxu0 %v616_v2  ;;  %v620_v5 = vld [vmem:[#allocation6 + $0x24] ss:$8 sps:$4 sm:$0xff]   ;;  %v622_v6 = vld [vmem:[#allocation6 + $0x20] ss:$8 sps:$4 sm:$0xff]   ;;  %v623_v7 = vld [vmem:[#allocation6 + $0x34] ss:$8 sps:$4 sm:$0xff]  }
  0x39   :  { %179 = vmatprep.subr.bf16.mxu0 %v617_v3  ;;  %v625_v8 = vld [vmem:[#allocation6 + $0x30] ss:$8 sps:$4 sm:$0xff]   ;;  %v626_v9 = vld [vmem:[#allocation6 + $0x44] ss:$8 sps:$4 sm:$0xff]   ;;  %v640_v11 = vld [vmem:[#allocation8] ss:$8 sps:$4 sm:$0xff]  }
  0x3a   :  { %v638_v10 = vld [vmem:[#allocation8 + $0x4] ss:$8 sps:$4 sm:$0xff]   ;;  %v641_v12 = vld [vmem:[#allocation8 + $0x14] ss:$8 sps:$4 sm:$0xff]   ;;  %v628_v13 = vld [vmem:[#allocation6 + $0x40] ss:$8 sps:$4 sm:$0xff]  }
  0x3b   :  { %426 = vmatprep.subr.bf16.mxu1 %v638_v10  ;;  %v643_v14 = vld [vmem:[#allocation8 + $0x10] ss:$8 sps:$4 sm:$0xff]   ;;  %v644_v15 = vld [vmem:[#allocation8 + $0x24] ss:$8 sps:$4 sm:$0xff]   ;;  %v629_v16 = vld [vmem:[#allocation6 + $0x54] ss:$8 sps:$4 sm:$0xff]  }
  0x3c   :  { %180 = vmatpush1.bf16.msra.mxu0 %v619_v4  ;;  %427 = vmatpush1.bf16.msra.mxu1 %v640_v11  ;;  %v631_v17 = vld [vmem:[#allocation6 + $0x50] ss:$8 sps:$4 sm:$0xff]   ;;  %v646_v18 = vld [vmem:[#allocation8 + $0x20] ss:$8 sps:$4 sm:$0xff]   ;;  %v647_v19 = vld [vmem:[#allocation8 + $0x34] ss:$8 sps:$4 sm:$0xff]  }
  0x3d   :  { %181 = vmatprep.subr.bf16.mxu0 %v620_v5  ;;  %428 = vmatprep.subr.bf16.mxu1 %v641_v12  ;;  %v632_v20 = vld [vmem:[#allocation6 + $0x64] ss:$8 sps:$4 sm:$0xff]   ;;  %v634_v21 = vld [vmem:[#allocation6 + $0x60] ss:$8 sps:$4 sm:$0xff]   ;;  %v649_v22 = vld [vmem:[#allocation8 + $0x30] ss:$8 sps:$4 sm:$0xff]  }
  0x3e   :  { %v650_v23 = vld [vmem:[#allocation8 + $0x44] ss:$8 sps:$4 sm:$0xff]   ;;  %v635_v24 = vld [vmem:[#allocation6 + $0x74] ss:$8 sps:$4 sm:$0xff]   ;;  %v637_v25 = vld [vmem:[#allocation6 + $0x70] ss:$8 sps:$4 sm:$0xff]  }
  0x3f   :  { %v652_v26 = vld [vmem:[#allocation8 + $0x40] ss:$8 sps:$4 sm:$0xff]   ;;  %v653_v27 = vld [vmem:[#allocation8 + $0x54] ss:$8 sps:$4 sm:$0xff]   ;;  %v655_v28 = vld [vmem:[#allocation8 + $0x50] ss:$8 sps:$4 sm:$0xff]  }
  0x40   :  { %182 = vmatpush1.bf16.msra.mxu0 %v622_v6  ;;  %429 = vmatpush1.bf16.msra.mxu1 %v643_v14  ;;  %v68_v29 = vld [vmem:[#allocation3] sm:$0xf]  ;;  %v656_v30 = vld [vmem:[#allocation8 + $0x64] ss:$8 sps:$4 sm:$0xff]   ;;  %v658_v31 = vld [vmem:[#allocation8 + $0x60] ss:$8 sps:$4 sm:$0xff]  }
  0x41   :  { %183 = vmatprep.subr.bf16.mxu0 %v623_v7  ;;  %430 = vmatprep.subr.bf16.mxu1 %v644_v15  ;;  %v659_v32 = vld [vmem:[#allocation8 + $0x74] ss:$8 sps:$4 sm:$0xff]   ;;  %v661_v33 = vld [vmem:[#allocation8 + $0x70] ss:$8 sps:$4 sm:$0xff]   ;;  %v662_v34 = vld [vmem:[#allocation8 + $0x84] ss:$8 sps:$4 sm:$0xff]  }
  0x42   :  { %v664_v35 = vld [vmem:[#allocation8 + $0x80] ss:$8 sps:$4 sm:$0xff]   ;;  %v665_v36 = vld [vmem:[#allocation8 + $0x94] ss:$8 sps:$4 sm:$0xff]   ;;  %v667_v37 = vld [vmem:[#allocation8 + $0x90] ss:$8 sps:$4 sm:$0xff]  }
  0x43   :  { %v668_v38 = vld [vmem:[#allocation8 + $0xa4] ss:$8 sps:$4 sm:$0xff]   ;;  %v670_v39 = vld [vmem:[#allocation8 + $0xa0] ss:$8 sps:$4 sm:$0xff]   ;;  %v671_v40 = vld [vmem:[#allocation8 + $0xb4] ss:$8 sps:$4 sm:$0xff]  }
  0x44   :  { %184 = vmatpush1.bf16.msra.mxu0 %v625_v8  ;;  %431 = vmatpush1.bf16.msra.mxu1 %v646_v18  ;;  %v673_v41 = vld [vmem:[#allocation8 + $0xb0] ss:$8 sps:$4 sm:$0xff]   ;;  %v674_v42 = vld [vmem:[#allocation8 + $0xc4] ss:$8 sps:$4 sm:$0xff]   ;;  %v676_v43 = vld [vmem:[#allocation8 + $0xc0] ss:$8 sps:$4 sm:$0xff]  }
  0x45   :  { %185 = vmatprep.subr.bf16.mxu0 %v626_v9  ;;  %432 = vmatprep.subr.bf16.mxu1 %v647_v19  ;;  %v677_v44 = vld [vmem:[#allocation8 + $0xd4] ss:$8 sps:$4 sm:$0xff]   ;;  %v679_v45 = vld [vmem:[#allocation8 + $0xd0] ss:$8 sps:$4 sm:$0xff]   ;;  %v680_v46 = vld [vmem:[#allocation8 + $0xe4] ss:$8 sps:$4 sm:$0xff]  }
  0x46   :  { %v682_v47 = vld [vmem:[#allocation8 + $0xe0] ss:$8 sps:$4 sm:$0xff]   ;;  %v683_v48 = vld [vmem:[#allocation8 + $0xf4] ss:$8 sps:$4 sm:$0xff]   ;;  %v685_v49 = vld [vmem:[#allocation8 + $0xf0] ss:$8 sps:$4 sm:$0xff]  }
  0x47   :  { %v88_v51 = vshrl.u32 %v87_v50, 7  ;;  %v85_v53 = vld [vmem:[%s896_s2] sm:$0x3]  ;;  %v786_v3 = vmov 1966171168  }
  0x48   :  { %186 = vmatpush1.bf16.msra.mxu0 %v628_v13  ;;  %433 = vmatpush1.bf16.msra.mxu1 %v649_v22  ;;  %v484_v4 = vunpack.c.l.s4 %v786_v3  ;;  %v605_v5 = vld.sshfl [vmem:[%s899_s5] sm:$0x11 pattern:$0x75316420] }
  0x49   :  { %187 = vmatprep.subr.bf16.mxu0 %v629_v16  ;;  %434 = vmatprep.subr.bf16.mxu1 %v650_v23  ;;  %v89_v52 = vsub.s32 0, %v88_v51  ;;  %v93_v54 = vsub.s32 1, %v88_v51  ;;  %v482_v7 = vcombine.high %v605_v5, %v605_v5  ;;  %v254_v11 = vld [vmem:[%s898_s4] sm:$0x3]  ;;  %s787_s4 = smov [#allocation9]  }
  0x4a   :  { %v485_v6 = vunpack.c.0.s8 %v484_v4  ;;  %s547_s19 = sshll.u32 %s787_s4, 4  ;;  %s548_s19 = int_to_ptr.vmem [resolvable:$true] %s547_s19 }
  0x4b   :  { %v90_v55 = vrot.slane %v85_v53, %v89_v52  ;;  %v94_v56 = vrot.slane %v85_v53, %v93_v54  ;;  %v259_v12 = vrot.slane %v254_v11, %v89_v52  ;;  %v263_v13 = vrot.slane %v254_v11, %v93_v54  ;;  %s752_s20 = scalar_lea.vmem %s548_s19, 16  ;;  %s756_s21 = scalar_lea.vmem %s548_s19, 32 }
  0x4c   :  { %188 = vmatpush1.bf16.msra.mxu0 %v631_v17  ;;  %435 = vmatpush1.bf16.msra.mxu1 %v652_v26  ;;  %v488_v8 = vsub.s32 %v485_v6, %v88_v51  ;;  %p753_p10 = scmp.ne.s32.totalorder %s548_s19, %s752_s20  ;;  %p757_p11 = scmp.lt.s32.totalorder %s548_s19, %s548_s19 }
  0x4d   :  { %189 = vmatprep.subr.bf16.mxu0 %v632_v20  ;;  %436 = vmatprep.subr.bf16.mxu1 %v653_v27  ;;  %p758_p12 = scmp.lt.s32.totalorder %s756_s21, %s752_s20 }
  0x4e   :  { %v496_v9 = vrot.slane %v482_v7, %v488_v8  ;;  %v489_v10 = vrot.slane %v605_v5, %v488_v8 }
  0x4f   :  { %p759_p13 = por %p758_p12, %p757_p11 }
  0x50   :  { %190 = vmatpush1.bf16.msra.mxu0 %v634_v21  ;;  %437 = vmatpush1.bf16.msra.mxu1 %v655_v28 }
  0x51   :  { %191 = vmatprep.subr.bf16.mxu0 %v635_v24  ;;  %438 = vmatprep.subr.bf16.mxu1 %v656_v30  ;;  %v473_v24 = vstv %s900_s6  ;;  %p760_p0 = pnand %p759_p13, %p753_p10 }
  0x54   :  { %192 = vmatpush1.bf16.msra.mxu0 %v637_v25  ;;  %439 = vmatpush1.bf16.msra.mxu1 %v658_v31 }
  0x55   :  { %440 = vmatprep.subr.bf16.mxu1 %v659_v32 }
  0x57   :  { %210 = vmatmul.mubr.bf16.vlgmr.msra.gmra.mrb[0].mxu0 %v68_v29 }
  0x58   :  { %441 = vmatpush1.bf16.msra.mxu1 %v661_v33  ;;  %531 = vmatprep.mubr.bf16.mxu0 %v496_v9 }
  0x59   :  { %442 = vmatprep.subr.bf16.mxu1 %v662_v34 }
  0x5c   :  { %443 = vmatpush1.bf16.msra.mxu1 %v664_v35 }
  0x5d   :  { %444 = vmatprep.subr.bf16.mxu1 %v665_v36 }
  0x60   :  { %445 = vmatpush1.bf16.msra.mxu1 %v667_v37 }
  0x61   :  { %446 = vmatprep.subr.bf16.mxu1 %v668_v38 }
  0x64   :  { %447 = vmatpush1.bf16.msra.mxu1 %v670_v39 }
  0x65   :  { %448 = vmatprep.subr.bf16.mxu1 %v671_v40 }
  0x68   :  { %449 = vmatpush1.bf16.msra.mxu1 %v673_v41 }
  0x69   :  { %450 = vmatprep.subr.bf16.mxu1 %v674_v42 }
  0x6c   :  { %451 = vmatpush1.bf16.msra.mxu1 %v676_v43 }
  0x6d   :  { %452 = vmatprep.subr.bf16.mxu1 %v677_v44 }
  0x70   :  { %453 = vmatpush1.bf16.msra.mxu1 %v679_v45 }
  0x71   :  { %454 = vmatprep.subr.bf16.mxu1 %v680_v46 }
  0x74   :  { %455 = vmatpush1.bf16.msra.mxu1 %v682_v47 }
  0x75   :  { %456 = vmatprep.subr.bf16.mxu1 %v683_v48 }
  0x78   :  { %457 = vmatpush1.bf16.msra.mxu1 %v685_v49 }
 0x12a   :  { %v211_v57 = vpop.f32.mrb[0].mxu0 }
 0x12b   :  { %v212_v58 = vadd.f32 %v211_v57, %v90_v55  ;;  %v213_v59 = vpop.f32.mrb[1].mxu0 }
 0x12c   :  { %v214_v60 = vadd.f32 %v213_v59, %v94_v56  ;;  %v215_v61 = vpop.f32.mrb[2].mxu0 }
 0x12d   :  { %v218_v62 = vmax.f32 %v212_v58, 0.0  ;;  %v216_v63 = vpop.f32.mrb[3].mxu0 }
 0x12e   :  { %v219_v0 = vmax.f32 %v214_v60, 0.0 }
 0x12f   :  { %v220_v2 = vpack.c.bf16 %v218_v62, %v218_v62 }
 0x130   :  { %v221_v1 = vpack.c.bf16 %v219_v0, %v219_v0 }
 0x132   :  { %458 = vmatprep.mubr.bf16.mxu1 %v221_v1 }
 0x133   :  { %459 = vmatmul.mubr.bf16.vlgmr.msra.gmra.mrb[0].mxu1 %v220_v2 }
 0x206   :  { %v460_v14 = vpop.f32.mrb[0].mxu1 }
 0x207   :  { %v461_v15 = vadd.f32 %v460_v14, %v259_v12  ;;  %v462_v16 = vpop.f32.mrb[1].mxu1 }
 0x208   :  { %v463_v17 = vadd.f32 %v462_v16, %v263_v13  ;;  %v464_v18 = vpop.f32.mrb[2].mxu1 }
 0x209   :  { %v467_v19 = vmax.f32 %v461_v15, 0.0  ;;  %v465_v20 = vpop.f32.mrb[3].mxu1 }
 0x20a   :  { %v468_v21 = vmax.f32 %v463_v17, 0.0 }
 0x20b   :  { %v469_v23 = vpack.c.bf16 %v467_v19, %v467_v19 }
 0x20c   :  { %v470_v22 = vpack.c.bf16 %v468_v21, %v468_v21 }
 0x20e   :  { %499 = vmatprep.subr.bf16.mxu0 %v470_v22 }
 0x20f   :  { %500 = vmatpush1.bf16.xpose.msra.mxu0 %v469_v23 }
 0x216   :  { %532 = vmatmul.mubr.bf16.vlgmr.msra.gmra.mrb[4].mxu0 %v489_v10 }
 0x2e9   :  { %v533_v25 = vpop.f32.mrb[4].mxu0 }
 0x2ea   :  { %v534_v26 = vadd.f32 %v533_v25, %v473_v24  ;;  %v535_v27 = vpop.f32.mrb[5].mxu0 }
 0x2eb   :  { %v536_v28 = vpop.f32.mrb[6].mxu0 }
 0x2ec   :  { %v537_v29 = vpop.f32.mrb[7].mxu0  ;;  %540 = vst.msk [vmem:[#allocation9] sm:$0x1] %vm539_vm0, %v534_v26 }
 0x2ed   :  { %763 = shalt.err (!%p760_p0)
}
 0x2ee   :  { %s764_s23 = scalar_lea.hbm %s901_s7, 16 }
 0x2ef   :  { %p765_p1 = scmp.ne.s32.totalorder %s901_s7, %s764_s23  ;;  %p768_p2 = scmp.lt.u32.totalorder %s764_s23, %s901_s7 }
 0x2f1   :  { %p770_p3 = pnand %p768_p2, %p765_p1 }
 0x2f3   :  { %773 = shalt.err (!%p770_p3)
}
 0x2f4   :  { %550 = dma.vmem_to_hbm [thread:$0]  %s548_s19, 16, %s901_s7, [#allocation5]  }
 0x2f5   :  { %778 = dma.done.wait [#allocation5], 16  }
 0x2f6   :  { %779 = vsyncadd [#allocation5], 4294967280 }
 0x2f7   :  { %554 = vsyncpa [#allocation4], 1 }
 0x2f8   :  { %555 = vsyncpa [#allocation7], 1 }
 0x2f9   :  { %556 = vsyncpa [#allocation5], 1 }

</bundles_post_ra>
